<compile_context>
chip_gen: v5e
topology: v5e:2x2
jax: 0.10.0
libtpu: 0.0.40
codegen_flags: <defaults>
</compile_context>

<pallas_src>
import functools

import jax
import jax.numpy as jnp
from jax.experimental import pallas as pl
from jax.experimental.pallas import tpu as pltpu


def _exp_dtype_for_device(compute_dtype):
    """bf16 exp only where the EUP supports it (v6e / v7x); f32 elsewhere."""
    if jnp.dtype(compute_dtype) == jnp.dtype(jnp.float32):
        return jnp.float32
    try:
        kind = jax.devices()[0].device_kind.lower()
    except Exception:
        kind = ""
    if "v6" in kind or "v7" in kind:
        return jnp.bfloat16
    return jnp.float32


def _graph_reasoning_kernel(x_ref, w_pt_ref, w_out_ref, o_ref,
                            phi_scr, theta_scr, v_scr,
                            *, inter_pad, out_dim, q_tile, exp_dtype, approx_recip):
    # x_ref:     (Bt, N, C)        compute dtype (bf16 or f32)
    # w_pt_ref:  (C, 2*Ipad)       fused [W_phi | W_theta], each half 128-lane padded
    # w_out_ref: (C, Dpad)         zero-padded; lane `out_dim` of v carries the row-sum
    # o_ref:     (Bt, Nq, Dpad)    compute dtype
    # phi_scr / theta_scr: (Bt, N, Ipad)   normalized projections (cached per batch tile)
    # v_scr:     (Bt, N, Dpad)     x @ W_out with a ones column at lane `out_dim`
    bt, n, c = x_ref.shape
    dpad = v_scr.shape[-1]
    cdt = x_ref.dtype
    qi = pl.program_id(1)

    # ---- per-batch-tile precompute: runs only on the first query tile ----
    @pl.when(qi == 0)
    def _():
        xk = x_ref[...].reshape(bt * n, c)

        # Fused [phi | theta] projection: one MXU matmul over all Bt*N rows.
        pt = jnp.dot(xk, w_pt_ref[...], preferred_element_type=jnp.float32)
        phi = pt[:, :inter_pad]          # 128-aligned lane slices (no relayout)
        theta = pt[:, inter_pad:]

        # Cosine normalization folded into the rows (rsqrt -> EUP slot).
        eps = jnp.float32(1e-12)
        phi_n = phi * jax.lax.rsqrt(jnp.sum(phi * phi, axis=-1, keepdims=True) + eps)
        theta_n = theta * jax.lax.rsqrt(jnp.sum(theta * theta, axis=-1, keepdims=True) + eps)
        phi_scr[...] = phi_n.reshape(bt, n, inter_pad).astype(cdt)
        theta_scr[...] = theta_n.reshape(bt, n, inter_pad).astype(cdt)

        # Value / output projection fused up-front: v = x @ W_out (Dpad lanes, padded
        # with zeros).  Write 1.0 into spare lane `out_dim` so the softmax denominator
        # comes out of the attention matmul itself, consistent with the numerator.
        v = jnp.dot(xk, w_out_ref[...], preferred_element_type=jnp.float32)
        lane = jax.lax.broadcasted_iota(jnp.int32, (1, dpad), 1)
        v = jnp.where(lane == out_dim, jnp.float32(1.0), v)
        v_scr[...] = v.reshape(bt, n, dpad).astype(cdt)

    # ---- per query-tile attention ----
    qs = pl.multiple_of(qi * q_tile, q_tile)
    phi_q = phi_scr[:, pl.ds(qs, q_tile), :]          # (Bt, Nq, Ipad)
    theta = theta_scr[...]                             # (Bt, N,  Ipad)

    # Cosine-similarity scores, bounded in [-1, 1] -> exp is safe without the
    # softmax max-subtraction.
    scores = jnp.einsum("bqk,bnk->bqn", phi_q, theta,
                        preferred_element_type=jnp.float32)      # (Bt, Nq, N)
    e = jnp.exp(scores.astype(exp_dtype))   # bf16 exp on v6e/v7x, f32 on v5e / f32 path
    e = e.astype(cdt)                        # no-op when exp_dtype == compute dtype

    # Unnormalized attention @ values; lane `out_dim` accumulates the row-sum (f32).
    out_raw = jnp.einsum("bqn,bnd->bqd", e, v_scr[...],
                         preferred_element_type=jnp.float32)     # (Bt, Nq, Dpad)

    row_sum = out_raw[:, :, out_dim:out_dim + 1]                 # (Bt, Nq, 1)
    inv = pl.reciprocal(row_sum, approx=approx_recip)
    o_ref[...] = jnp.maximum(out_raw * inv, 0.0).astype(o_ref.dtype)


def graph_reasoning_forward(feat_map, w_phi, w_theta, w_out, *,
                            compute_dtype=jnp.bfloat16, batch_tile=None, q_tile=None):
    """feat_map: (B, C, H, W) float32.  Returns (B, out_dim, H, W) float32."""
    B, C, H, W = feat_map.shape
    N = H * W
    I = w_phi.shape[1]
    Dout = w_out.shape[1]
    Ipad = pl.cdiv(I, 128) * 128
    Dpad = pl.cdiv(Dout + 1, 128) * 128      # at least one spare lane for the row-sum

    # Batch tile: prefer a divisor of B (no wasted padded-row compute) and keep the
    # parallel grid axis >= 2 steps so v7x's two TensorCores both get work.
    if batch_tile is None:
        batch_tile = 1
        for d in range(min(B, 4), 0, -1):
            if B % d == 0 and B // d >= 2:
                batch_tile = d
                break
    num_btiles = pl.cdiv(B, batch_tile)
    Bp = num_btiles * batch_tile

    # Query tile: largest multiple-of-8 divisor of N that keeps the (Bt, Nq, N)
    # scores/e slab within a conservative VMEM budget.
    if q_tile is None:
        budget = 12 * 1024 * 1024
        q_tile = N
        for cand in (512, 256, 128, 64, 32, 16, 8):
            if N % cand == 0:
                q_tile = cand
                if batch_tile * cand * N * 6 <= budget:
                    break
    assert N % q_tile == 0, "q_tile must divide H*W"
    num_qtiles = N // q_tile

    # Glue: NCHW -> (B, N, C); the compute-dtype cast is folded into the same pass.
    feat_vec = jnp.transpose(feat_map, (0, 2, 3, 1)).reshape(B, N, C).astype(compute_dtype)
    if Bp != B:   # only reachable if an explicit batch_tile does not divide B
        feat_vec = jnp.pad(feat_vec, ((0, Bp - B), (0, 0), (0, 0)))

    # Fused projection weight (each half padded to 128 lanes) + padded output weight.
    w_phi_p = jnp.pad(w_phi, ((0, 0), (0, Ipad - I)))
    w_theta_p = jnp.pad(w_theta, ((0, 0), (0, Ipad - I)))
    w_pt = jnp.concatenate([w_phi_p, w_theta_p], axis=1).astype(compute_dtype)   # (C, 2*Ipad)
    w_out_p = jnp.pad(w_out, ((0, 0), (0, Dpad - Dout))).astype(compute_dtype)   # (C, Dpad)

    exp_dtype = _exp_dtype_for_device(compute_dtype)
    approx_recip = jnp.dtype(compute_dtype) != jnp.dtype(jnp.float32)

    kernel = functools.partial(
        _graph_reasoning_kernel, inter_pad=Ipad, out_dim=Dout, q_tile=q_tile,
        exp_dtype=exp_dtype, approx_recip=approx_recip)

    itemsize = jnp.dtype(compute_dtype).itemsize
    flops = 2 * Bp * N * (C * 2 * Ipad + N * Ipad + N * Dpad + C * Dpad)
    transcendentals = Bp * N * (N + 3)
    bytes_accessed = (Bp * N * C + C * 2 * Ipad + C * Dpad + Bp * N * Dpad) * itemsize

    out = pl.pallas_call(
        kernel,
        out_shape=jax.ShapeDtypeStruct((Bp, N, Dpad), compute_dtype),
        grid_spec=pltpu.PrefetchScalarGridSpec(
            num_scalar_prefetch=0,
            grid=(num_btiles, num_qtiles),
            in_specs=[
                pl.BlockSpec((batch_tile, N, C), lambda b, q: (b, 0, 0)),
                pl.BlockSpec((C, 2 * Ipad), lambda b, q: (0, 0)),
                pl.BlockSpec((C, Dpad), lambda b, q: (0, 0)),
            ],
            out_specs=pl.BlockSpec((batch_tile, q_tile, Dpad), lambda b, q: (b, q, 0)),
            scratch_shapes=[
                pltpu.VMEM((batch_tile, N, Ipad), compute_dtype),   # phi_n
                pltpu.VMEM((batch_tile, N, Ipad), compute_dtype),   # theta_n
                pltpu.VMEM((batch_tile, N, Dpad), compute_dtype),   # v (+ ones column)
            ],
        ),
        compiler_params=pltpu.CompilerParams(
            dimension_semantics=("parallel", "arbitrary"),
            # 48 MiB scoped VMEM is safe on v5e/v6e (128 MiB physical) and leaves
            # headroom on v7x (64 MiB physical per TensorCore).
            vmem_limit_bytes=48 * 1024 * 1024,
        ),
        cost_estimate=pl.CostEstimate(
            flops=flops, transcendentals=transcendentals, bytes_accessed=bytes_accessed),
    )(feat_vec, w_pt, w_out_p)

    # Glue: drop batch / lane padding, (B, N, Dout) -> (B, Dout, H, W), f32 result.
    out = out[:B, :, :Dout]
    return jnp.transpose(out.reshape(B, H, W, Dout), (0, 3, 1, 2)).astype(jnp.float32)


def _xavier_uniform(key, shape):
    fan_in, fan_out = shape[0], shape[1]
    bound = jnp.sqrt(6.0 / (fan_in + fan_out))
    return jax.random.uniform(key, shape, jnp.float32, minval=-bound, maxval=bound)


def _reference(feat_map, w_phi, w_theta, w_out):
    B, C, H, W = feat_map.shape
    fv = jnp.transpose(feat_map, (0, 2, 3, 1)).reshape(B, H * W, C)
    phi = fv @ w_phi
    theta = fv @ w_theta
    prod = jnp.einsum("bnk,bmk->bnm", phi, theta)
    pn = jnp.linalg.norm(phi, axis=-1, keepdims=True)
    tn = jnp.linalg.norm(theta, axis=-1, keepdims=True)
    sim = jax.nn.softmax(prod / (pn * jnp.swapaxes(tn, 1, 2)), axis=-1)
    ref = jnp.maximum((sim @ fv) @ w_out, 0.0)
    return jnp.transpose(ref.reshape(B, H, W, w_out.shape[1]), (0, 3, 1, 2))


if __name__ == "__main__":
    # Small shapes consistent with the module: B=2, in_dim=32, H=W=8 (N=64),
    # inter_dim=16, out_dim=32.
    B, in_dim, H, W = 2, 32, 8, 8
    inter_dim, out_dim = 16, 32

    key = jax.random.PRNGKey(0)
    k_feat, k_phi, k_theta, k_w = jax.random.split(key, 4)

    feat_map = jax.random.normal(k_feat, (B, in_dim, H, W), jnp.float32)

    # nn.Linear(in_dim, inter_dim, bias=False) weight is (inter_dim, in_dim);
    # the kernel consumes its transpose (in_dim, inter_dim) so x @ W == x @ Wlin^T.
    w_phi = _xavier_uniform(k_phi, (in_dim, inter_dim))
    w_theta = _xavier_uniform(k_theta, (in_dim, inter_dim))
    w_out = _xavier_uniform(k_w, (in_dim, out_dim))

    ref = _reference(feat_map, w_phi, w_theta, w_out)

    # f32 path: exact-reciprocal check of the restructured math against the JAX ref.
    out_f32 = graph_reasoning_forward(feat_map, w_phi, w_theta, w_out,
                                      compute_dtype=jnp.float32)
    jax.block_until_ready(out_f32)
    assert out_f32.shape == ref.shape
    assert jnp.allclose(out_f32, ref, atol=2e-3, rtol=2e-3), \
        float(jnp.max(jnp.abs(out_f32 - ref)))

    # bf16 MXU path (default, fast): looser tolerance for bf16 inputs / bf16 exp.
    out_bf16 = graph_reasoning_forward(feat_map, w_phi, w_theta, w_out)
    jax.block_until_ready(out_bf16)
    assert jnp.allclose(out_bf16, ref, atol=5e-2, rtol=5e-2), \
        float(jnp.max(jnp.abs(out_bf16 - ref)))

    print("KERNEL_OK")
</pallas_src>

<mosaic_0001>
module attributes {stable_mosaic.version = 11 : i64} {
  func.func @_graph_reasoning_kernel(%arg0: i32, %arg1: i32, %arg2: memref<1x64x32xf32, #tpu.memory_space<vmem>>, %arg3: memref<32x256xf32, #tpu.memory_space<vmem>>, %arg4: memref<32x128xf32, #tpu.memory_space<vmem>>, %arg5: memref<1x64x128xf32, #tpu.memory_space<vmem>>, %arg6: memref<1x64x128xf32, #tpu.memory_space<vmem>>, %arg7: memref<1x64x128xf32, #tpu.memory_space<vmem>>, %arg8: memref<1x64x128xf32, #tpu.memory_space<vmem>>) attributes {dimension_semantics = [#tpu.dimension_semantics<parallel>, #tpu.dimension_semantics<arbitrary>], iteration_bounds = array<i64: 2, 1>, scalar_prefetch = 0 : i64, scratch_operands = 3 : i64, tpu.core_type = #tpu.core_type<tc>, window_params = [{transform_indices = @transform_0, window_bounds = array<i64: 1, 64, 32>}, {pipeline_mode = #tpu.pipeline_mode<synchronous>, transform_indices = @transform_1, window_bounds = array<i64: 32, 256>}, {pipeline_mode = #tpu.pipeline_mode<synchronous>, transform_indices = @transform_2, window_bounds = array<i64: 32, 128>}, {transform_indices = @transform_3, window_bounds = array<i64: 1, 64, 128>}]} {
    %c0_i32 = arith.constant 0 : i32
    %0 = arith.cmpi eq, %arg1, %c0_i32 : i32
    %1 = arith.extui %0 : i1 to i32
    %c0_i32_0 = arith.constant 0 : i32
    %2 = arith.cmpi ne, %1, %c0_i32_0 : i32
    scf.if %2 {
      %c0_13 = arith.constant 0 : index
      %c0_14 = arith.constant 0 : index
      %c0_15 = arith.constant 0 : index
      %19 = vector.load %arg2[%c0_13, %c0_14, %c0_15] : memref<1x64x32xf32, #tpu.memory_space<vmem>>, vector<1x64x32xf32>
      %20 = vector.shape_cast %19 : vector<1x64x32xf32> to vector<64x32xf32>
      %c0_16 = arith.constant 0 : index
      %c0_17 = arith.constant 0 : index
      %21 = vector.load %arg3[%c0_16, %c0_17] : memref<32x256xf32, #tpu.memory_space<vmem>>, vector<32x256xf32>
      %cst_18 = arith.constant dense<0.000000e+00> : vector<64x256xf32>
      %22 = tpu.matmul %20, %21, %cst_18 {dimension_numbers = #tpu.dot_dimension_numbers<[1], [0], [0], [1], [0, 0, 1, 1], [], []>} : vector<64x32xf32>, vector<32x256xf32>, vector<64x256xf32> -> vector<64x256xf32>
      %23 = vector.extract_strided_slice %22 {offsets = [0, 0], sizes = [64, 128], strides = [1, 1]} : vector<64x256xf32> to vector<64x128xf32>
      %24 = vector.extract_strided_slice %22 {offsets = [0, 128], sizes = [64, 128], strides = [1, 1]} : vector<64x256xf32> to vector<64x128xf32>
      %25 = arith.mulf %23, %23 : vector<64x128xf32>
      %cst_19 = arith.constant dense<0.000000e+00> : vector<64xf32>
      %26 = vector.multi_reduction <add>, %25, %cst_19 [1] : vector<64x128xf32> to vector<64xf32>
      %27 = vector.shape_cast %26 : vector<64xf32> to vector<64x1xf32>
      %cst_20 = arith.constant 9.99999996E-13 : f32
      %28 = vector.broadcast %cst_20 : f32 to vector<64x1xf32>
      %29 = arith.addf %27, %28 : vector<64x1xf32>
      %30 = math.rsqrt %29 : vector<64x1xf32>
      %31 = vector.broadcast %30 : vector<64x1xf32> to vector<64x128xf32>
      %32 = arith.mulf %23, %31 : vector<64x128xf32>
      %33 = arith.mulf %24, %24 : vector<64x128xf32>
      %cst_21 = arith.constant dense<0.000000e+00> : vector<64xf32>
      %34 = vector.multi_reduction <add>, %33, %cst_21 [1] : vector<64x128xf32> to vector<64xf32>
      %35 = vector.shape_cast %34 : vector<64xf32> to vector<64x1xf32>
      %cst_22 = arith.constant 9.99999996E-13 : f32
      %36 = vector.broadcast %cst_22 : f32 to vector<64x1xf32>
      %37 = arith.addf %35, %36 : vector<64x1xf32>
      %38 = math.rsqrt %37 : vector<64x1xf32>
      %39 = vector.broadcast %38 : vector<64x1xf32> to vector<64x128xf32>
      %40 = arith.mulf %24, %39 : vector<64x128xf32>
      %41 = vector.shape_cast %32 : vector<64x128xf32> to vector<1x64x128xf32>
      %c0_23 = arith.constant 0 : index
      %c0_24 = arith.constant 0 : index
      %c0_25 = arith.constant 0 : index
      %42 = vector.load %arg6[%c0_23, %c0_24, %c0_25] : memref<1x64x128xf32, #tpu.memory_space<vmem>>, vector<1x64x128xf32>
      tpu.vector_store %arg6[%c0_23, %c0_24, %c0_25], %41 {strides = array<i32>} : memref<1x64x128xf32, #tpu.memory_space<vmem>>, vector<1x64x128xf32>,
      %43 = vector.shape_cast %40 : vector<64x128xf32> to vector<1x64x128xf32>
      %c0_26 = arith.constant 0 : index
      %c0_27 = arith.constant 0 : index
      %c0_28 = arith.constant 0 : index
      %44 = vector.load %arg7[%c0_26, %c0_27, %c0_28] : memref<1x64x128xf32, #tpu.memory_space<vmem>>, vector<1x64x128xf32>
      tpu.vector_store %arg7[%c0_26, %c0_27, %c0_28], %43 {strides = array<i32>} : memref<1x64x128xf32, #tpu.memory_space<vmem>>, vector<1x64x128xf32>,
      %c0_29 = arith.constant 0 : index
      %c0_30 = arith.constant 0 : index
      %45 = vector.load %arg4[%c0_29, %c0_30] : memref<32x128xf32, #tpu.memory_space<vmem>>, vector<32x128xf32>
      %cst_31 = arith.constant dense<0.000000e+00> : vector<64x128xf32>
      %46 = tpu.matmul %20, %45, %cst_31 {dimension_numbers = #tpu.dot_dimension_numbers<[1], [0], [0], [1], [0, 0, 1, 1], [], []>} : vector<64x32xf32>, vector<32x128xf32>, vector<64x128xf32> -> vector<64x128xf32>
      %47 = tpu.iota {dimensions = array<i32: 1>} : vector<1x128xi32>
      %c32_i32 = arith.constant 32 : i32
      %48 = vector.broadcast %c32_i32 : i32 to vector<1x128xi32>
      %49 = arith.cmpi eq, %47, %48 : vector<1x128xi32>
      %cst_32 = arith.constant 1.000000e+00 : f32
      %50 = vector.shape_cast %49 : vector<1x128xi1> to vector<1x128xi1>
      %51 = vector.broadcast %50 : vector<1x128xi1> to vector<64x128xi1>
      %52 = vector.broadcast %cst_32 : f32 to vector<64x128xf32>
      %53 = arith.select %51, %52, %46 : vector<64x128xi1>, vector<64x128xf32>
      %54 = vector.shape_cast %53 : vector<64x128xf32> to vector<1x64x128xf32>
      %c0_33 = arith.constant 0 : index
      %c0_34 = arith.constant 0 : index
      %c0_35 = arith.constant 0 : index
      %55 = vector.load %arg8[%c0_33, %c0_34, %c0_35] : memref<1x64x128xf32, #tpu.memory_space<vmem>>, vector<1x64x128xf32>
      tpu.vector_store %arg8[%c0_33, %c0_34, %c0_35], %54 {strides = array<i32>} : memref<1x64x128xf32, #tpu.memory_space<vmem>>, vector<1x64x128xf32>,
    } else {
    }
    %c64_i32 = arith.constant 64 : i32
    %3 = arith.muli %arg1, %c64_i32 : i32
    %4 = tpu.assume_multiple %3, 64 : i32
    %c0 = arith.constant 0 : index
    %5 = arith.index_cast %4 : i32 to index
    %c0_1 = arith.constant 0 : index
    %6 = vector.load %arg6[%c0, %5, %c0_1] : memref<1x64x128xf32, #tpu.memory_space<vmem>>, vector<1x64x128xf32>
    %c0_2 = arith.constant 0 : index
    %c0_3 = arith.constant 0 : index
    %c0_4 = arith.constant 0 : index
    %7 = vector.load %arg7[%c0_2, %c0_3, %c0_4] : memref<1x64x128xf32, #tpu.memory_space<vmem>>, vector<1x64x128xf32>
    "tpu.trace_start"() <{level = 10 : i32, message = "bqk,bnk->bqn"}> : () -> ()
    %cst = arith.constant dense<0.000000e+00> : vector<1x64x64xf32>
    %8 = tpu.matmul %6, %7, %cst {dimension_numbers = #tpu.dot_dimension_numbers<[2], [2], [1], [1], [0, 0, 0, 1, 1, 1], [0], [0]>} : vector<1x64x128xf32>, vector<1x64x128xf32>, vector<1x64x64xf32> -> vector<1x64x64xf32>
    "tpu.trace_stop"() : () -> ()
    %9 = math.exp %8 : vector<1x64x64xf32>
    %c0_5 = arith.constant 0 : index
    %c0_6 = arith.constant 0 : index
    %c0_7 = arith.constant 0 : index
    %10 = vector.load %arg8[%c0_5, %c0_6, %c0_7] : memref<1x64x128xf32, #tpu.memory_space<vmem>>, vector<1x64x128xf32>
    "tpu.trace_start"() <{level = 10 : i32, message = "bqn,bnd->bqd"}> : () -> ()
    %cst_8 = arith.constant dense<0.000000e+00> : vector<1x64x128xf32>
    %11 = tpu.matmul %9, %10, %cst_8 {dimension_numbers = #tpu.dot_dimension_numbers<[2], [1], [1], [2], [0, 0, 0, 1, 1, 2], [0], [0]>} : vector<1x64x64xf32>, vector<1x64x128xf32>, vector<1x64x128xf32> -> vector<1x64x128xf32>
    "tpu.trace_stop"() : () -> ()
    %12 = vector.extract_strided_slice %11 {offsets = [0, 0, 32], sizes = [1, 64, 1], strides = [1, 1, 1]} : vector<1x64x128xf32> to vector<1x64x1xf32>
    %13 = tpu.reciprocal %12 : vector<1x64x1xf32> -> vector<1x64x1xf32>
    %14 = vector.broadcast %13 : vector<1x64x1xf32> to vector<1x64x128xf32>
    %15 = arith.mulf %11, %14 : vector<1x64x128xf32>
    %cst_9 = arith.constant 0.000000e+00 : f32
    %16 = vector.broadcast %cst_9 : f32 to vector<1x64x128xf32>
    %17 = arith.maximumf %15, %16 : vector<1x64x128xf32>
    %c0_10 = arith.constant 0 : index
    %c0_11 = arith.constant 0 : index
    %c0_12 = arith.constant 0 : index
    %18 = vector.load %arg5[%c0_10, %c0_11, %c0_12] : memref<1x64x128xf32, #tpu.memory_space<vmem>>, vector<1x64x128xf32>
    tpu.vector_store %arg5[%c0_10, %c0_11, %c0_12], %17 {strides = array<i32>} : memref<1x64x128xf32, #tpu.memory_space<vmem>>, vector<1x64x128xf32>,
    return
  }
  func.func @transform_0(%arg0: i32, %arg1: i32) -> (i32, i32, i32) {
    %c0_i32 = arith.constant 0 : i32
    %c0_i32_0 = arith.constant 0 : i32
    %c0_i32_1 = arith.constant 0 : i32
    return %arg0, %c0_i32, %c0_i32_0 : i32, i32, i32
  }
  func.func @transform_1(%arg0: i32, %arg1: i32) -> (i32, i32) {
    %c0_i32 = arith.constant 0 : i32
    %c0_i32_0 = arith.constant 0 : i32
    %c0_i32_1 = arith.constant 0 : i32
    return %c0_i32, %c0_i32_0 : i32, i32
  }
  func.func @transform_2(%arg0: i32, %arg1: i32) -> (i32, i32) {
    %c0_i32 = arith.constant 0 : i32
    %c0_i32_0 = arith.constant 0 : i32
    %c0_i32_1 = arith.constant 0 : i32
    return %c0_i32, %c0_i32_0 : i32, i32
  }
  func.func @transform_3(%arg0: i32, %arg1: i32) -> (i32, i32, i32) {
    %c0_i32 = arith.constant 0 : i32
    %c0_i32_0 = arith.constant 0 : i32
    return %arg0, %arg1, %c0_i32 : i32, i32, i32
  }
}

</mosaic_0001>

<bundles_post_ra>
// kernel: tpu_custom_call.1
= control target key start
LH: loop header
LB: loop body
LE: loop exit
PB: predicated region body
PF: predicated region fallthrough
CT: control target
= control target key end

     0   :  { %8 = vsyncpa [#allocation6], 0  ;;  %s1851_s0 = inlined_call_operand.vmem [shape: f32[2,64,32], index: 0, kind: input, shape index: {}]   ;;  %s1852_s1 = inlined_call_operand.vmem [shape: f32[32,256], index: 1, kind: input, shape index: {}]   ;;  %s1853_s2 = inlined_call_operand.vmem [shape: f32[32,128], index: 2, kind: input, shape index: {}]   ;;  %s1854_s3 = inlined_call_operand.hbm [shape: f32[2,64,128], index: 3, kind: output, shape index: {}]  }
   0x1   :  { %10 = vsyncpa [#allocation6 + $0x1], 0  ;;  %s1334_s12 = smov 0   ;;  %s1336_s13 = smov 0  }
   0x2   :  { %s1338_s14 = smov 0   ;;  %s1340_s15 = smov 0  }
   0x3   :  { %s1342_s16 = smov 0   ;;  %s1344_s17 = smov 0  }
   0x4 LB: > { %s1051_s18 = sadd.s32 4294967295, %s1309_s17   ;;  %s1052_s19 = sadd.s32 4294967294, %s1309_s17   ;;  %s1309_s17 = sphi %s1344_s17, %s16_s17   ;;  %s1305_s16 = sphi %s1342_s16, %s1861_s16   ;;  %s1301_s15 = sphi %s1340_s15, %s1860_s15   ;;  %s1297_s14 = sphi %s1338_s14, %s1859_s14   ;;  %s1293_s13 = sphi %s1336_s13, %s1858_s13   ;;  %s1289_s12 = sphi %s1334_s12, %s1857_s12  }
   0x5   : > { %s28_s20 = sadd.s32 1, %s1305_s16  ;;  %s105_s21 = sadd.s32 1, %s1297_s14 }
   0x6   : > { %p30_p0 = scmp.ge.s32.totalorder %s28_s20, 2  ;;  %p115_p1 = scmp.ne.s32.totalorder %s1297_s14, %s1293_s13 }
   0x7   : > { %p116_p2 = scmp.eq.s32.totalorder %s1051_s18, 1  ;;  %p121_p3 = scmp.ne.s32.totalorder %s1293_s13, %s1289_s12 }
   0x8   : > { %s1863_s20 = smov (%p30_p0, %s28_s20), 0  ;;  %p122_p5 = scmp.eq.s32.totalorder %s1052_s19, 1 }
   0x9   : > { %p1374_p4 = por %p116_p2, %p115_p1  ;;  %s100_s23 = ssub.s32 %s1305_s16, %s1863_s20 }
   0xa   : > { %p1055_p6 = scmp.ge.s32.totalorder %s1309_s17, 1  ;;  %p103_p7 = scmp.eq.s32.totalorder %s100_s23, 0 }
   0xb   : > { %p1381_p8 = por %p122_p5, %p121_p3  ;;  %p154_p9 = scmp.lt.s32.totalorder %s1309_s17, 3 }
   0xc   : > { %s1387_s25 = scalar_select %p103_p7, %s1297_s14, %s105_s21  }
   0xd   : > { %p155_p10 = pnand %p1055_p6, %p154_p9 }
   0xe   : > { %p178_p11 = scmp.lt.s32.totalorder (!%p155_p10), %s1301_s15, 1  ;;  %s1097_s21 = sshll.u32 (!%p155_p10), %s1301_s15, 6 }
   0xf   : > { %158 = sbr.rel (%p155_p10) target bundleno = 864 (0x360), region = 32  ;;  %s972_s27 = scalar_lea.hbm (!%p155_p10), %s1854_s3, %s1097_s21 }
  0x10   : > { %s975_s29 = sshll.u32 (!%p155_p10), %s972_s27, 4  ;;  %s1251_s7 = scalar_lea.hbm (!%p155_p10), %s1854_s3, 128  ;;  %s976_s29 = int_to_ptr.hbm [resolvable:$true] %s975_s29 }
  0x11   : > { %s1245_s4 = sshra.s32 (!%p155_p10), %s976_s29, 4  ;;  %s1246_s4 = int_to_ptr.hbm [resolvable:$true] %s1245_s4 }
  0x12   : > { %p1252_p1 = scmp.lt.s32.totalorder (!%p155_p10), %s1246_s4, %s1854_s3 }
  0x14   : > { %v202_v0 = vld [vmem:[%s1852_s1 + $0x30] sm:$0xff]  ;;  %v200_v1 = vld [vmem:[%s1852_s1 + $0x20] sm:$0xff]  ;;  %s179_s5 = scalar_select %p178_p11, %s1301_s15, 1  ;;  %vm204_vm0 = vcmask 261120   ;;  %v203_v5 = vld [vmem:[%s1852_s1 + $0x38] sm:$0xff] }
  0x15   : > { %1098 = vmatpush.msra.mxu1 %v202_v0  ;;  %241 = vmatpush.msra.mxu0 %v202_v0  ;;  %v198_v2 = vld [vmem:[%s1852_s1 + $0x10] sm:$0xff]  ;;  %v196_v3 = vld [vmem:[%s1852_s1] sm:$0xff]  ;;  %v201_v7 = vld [vmem:[%s1852_s1 + $0x28] sm:$0xff] }
  0x16   : > { %1099 = vmatpush.msra.mxu2 %v202_v0  ;;  %s1096_s8 = sshll.u32 %s179_s5, 6  ;;  %v199_v8 = vld [vmem:[%s1852_s1 + $0x18] sm:$0xff]  ;;  %v197_v9 = vld [vmem:[%s1852_s1 + $0x8] sm:$0xff]  ;;  %v569_v35 = vld [vmem:[%s1853_s2 + $0x10] sm:$0xff]  ;;  %s1247_s5 = scalar_lea.hbm %s1246_s4, 64 }
  0x17   : > { %1100 = vmatpush.msra.mxu1 %v200_v1  ;;  %242 = vmatpush.msra.mxu0 %v200_v1  ;;  %s1406_s11 = scalar_lea.vmem %s1851_s0, %s1096_s8  ;;  %v570_v30 = vld [vmem:[%s1853_s2 + $0x18] sm:$0xff]  ;;  %v568_v36 = vld [vmem:[%s1853_s2 + $0x8] sm:$0xff]  ;;  %v567_v38 = vld [vmem:[%s1853_s2] sm:$0xff]  ;;  %p1248_p12 = scmp.ne.s32.totalorder %s1246_s4, %s1247_s5 }
  0x18   : > { %1101 = vmatpush.msra.mxu2 %v200_v1  ;;  %v1409_v4 = vld [vmem:[%s1406_s11 + $0x18] sm:$0xff]  ;;  %v1415_v6 = vld [vmem:[%s1406_s11] sm:$0xff]  ;;  %v1434_v11 = vld [vmem:[%s1406_s11 + $0x8] sm:$0xff]  ;;  %p1253_p2 = scmp.lt.s32.totalorder %s1251_s7, %s1247_s5 }
  0x19   : > { %1102 = vmatpush.msra.mxu1 %v198_v2  ;;  %243 = vmatpush.msra.mxu0 %v198_v2  ;;  %v1431_v10 = vld [vmem:[%s1406_s11 + $0x20] sm:$0xff]  ;;  %v1441_v12 = vld [vmem:[%s1406_s11 + $0x28] sm:$0xff]  ;;  %v1444_v13 = vld [vmem:[%s1406_s11 + $0x10] sm:$0xff]  ;;  %p1249_p13 = pnand %p1248_p12, %p1374_p4 }
  0x1a   : > { %1103 = vmatpush.msra.mxu2 %v198_v2  ;;  %v1455_v14 = vld [vmem:[%s1406_s11 + $0x30] sm:$0xff]  ;;  %v1462_v15 = vld [vmem:[%s1406_s11 + $0x38] sm:$0xff]  ;;  %s175_s11 = sand.u32 1, %s1293_s13   ;;  %p1254_p3 = por %p1253_p2, %p1252_p1 }
  0x1b   : > { %1104 = vmatpush.msra.mxu1 %v196_v3  ;;  %244 = vmatpush.msra.mxu0 %v196_v3  ;;  %s1056_s18 = sshll.u32 %s175_s11, 6  ;;  %s959_s30 = scalar_lea.sflag [#allocation6], %s175_s11 }
  0x1c   : > { %1062 = vmatmul.msk.f32.vlgmr.msra.gmra.mxu1 %vm204_vm0, %v1409_v4  ;;  %1059 = vmatmul.msk.f32.vlgmr.msra.gmra.mxu0 %vm204_vm0, %v1415_v6  ;;  %s1796_s19 = scalar_lea.vmem [#allocation5], %s1056_s18  ;;  %p1250_p0 = pneg %p1249_p13 }
  0x1d   : > { %282 = vmatpush.msrb.mxu1 %v203_v5  ;;  %1105 = vmatpush.msra.mxu2 %v196_v3  ;;  %s973_s28 = sshll.u32 %s1796_s19, 4  ;;  %s974_s28 = int_to_ptr.vmem [resolvable:$true] %s973_s28 }
  0x1e   : > { %1065 = vmatmul.msk.f32.vlgmr.msra.gmra.mxu2 %vm204_vm0, %v1455_v14  ;;  %p1255_p5 = pnand %p1254_p3, %p1250_p0 }
  0x1f   : > { %283 = vmatpush.msrb.mxu1 %v201_v7  ;;  %583 = vmatpush.msrb.mxu2 %v570_v30 }
  0x21   : > { %284 = vmatpush.msrb.mxu1 %v199_v8  ;;  %584 = vmatpush.msrb.mxu2 %v569_v35 }
  0x23   : > { %285 = vmatpush.msrb.mxu1 %v197_v9  ;;  %585 = vmatpush.msrb.mxu2 %v568_v36 }
  0x24   : > { %1063 = vmatmul.msk.f32.gmra.mxu1 %vm204_vm0, %v1431_v10  ;;  %1060 = vmatmul.msk.f32.gmra.mxu0 %vm204_vm0, %v1434_v11 }
  0x25   : > { %586 = vmatpush.msrb.mxu2 %v567_v38 }
  0x26   : > { %1066 = vmatmul.msk.f32.gmra.mxu2 %vm204_vm0, %v1462_v15 }
  0x2c   : > { %1064 = vmatmul.msk.f32.gmra.mxu1 %vm204_vm0, %v1441_v12  ;;  %1061 = vmatmul.msk.f32.gmra.mxu0 %vm204_vm0, %v1444_v13 }
  0x2e   : > { %1075 = vmatmul.msk.f32.vlgmr.msrb.gmra.mxu2 %vm204_vm0, %v1415_v6 }
  0x34   : > { %1067 = vmatmul.msk.f32.vlgmr.msrb.gmra.mxu1 %vm204_vm0, %v1415_v6 }
  0x36   : > { %1076 = vmatmul.msk.f32.gmra.mxu2 %vm204_vm0, %v1434_v11 }
  0x3c   : > { %1068 = vmatmul.msk.f32.gmra.mxu1 %vm204_vm0, %v1434_v11 }
  0x3e   : > { %1077 = vmatmul.msk.f32.gmra.mxu2 %vm204_vm0, %v1444_v13 }
  0x44   : > { %1069 = vmatmul.msk.f32.gmra.mxu1 %vm204_vm0, %v1444_v13 }
  0x46   : > { %1078 = vmatmul.msk.f32.gmra.mxu2 %vm204_vm0, %v1409_v4 }
  0x4c   : > { %1070 = vmatmul.msk.f32.gmra.mxu1 %vm204_vm0, %v1409_v4 }
  0x4e   : > { %1079 = vmatmul.msk.f32.gmra.mxu2 %vm204_vm0, %v1431_v10 }
  0x54   : > { %1071 = vmatmul.msk.f32.gmra.mxu1 %vm204_vm0, %v1431_v10 }
  0x56   : > { %1080 = vmatmul.msk.f32.gmra.mxu2 %vm204_vm0, %v1441_v12 }
  0x5c   : > { %1072 = vmatmul.msk.f32.gmra.mxu1 %vm204_vm0, %v1441_v12 }
  0x5e   : > { %1081 = vmatmul.msk.f32.gmra.mxu2 %vm204_vm0, %v1455_v14 }
  0x64   : > { %1073 = vmatmul.msk.f32.gmra.mxu1 %vm204_vm0, %v1455_v14 }
  0x66   : > { %1082 = vmatmul.msk.f32.gmra.mxu2 %vm204_vm0, %v1462_v15 }
  0x6c   : > { %1074 = vmatmul.msk.f32.gmra.mxu1 %vm204_vm0, %v1462_v15 }
  0x99   : > { %v1476_v16 = vpop.f32.mrf.mxu1  ;;  %v1496_v26 = vpop.f32.mrf.mxu0 }
  0x9a   : > { %v311_v27 = vmul.f32 %v1496_v26, %v1496_v26  ;;  %v314_v33 = vmul.f32 %v1476_v16, %v1476_v16 }
  0xa1   : > { %v1478_v17 = vpop.f32.mrf.mxu1  ;;  %v1513_v34 = vpop.f32.mrf.mxu0 }
  0xa2   : > { %v1521_v37 = vpop.f32.mrf.mxu2  ;;  %v312_v48 = vmul.f32 %v1513_v34, %v1513_v34  ;;  %v315_v49 = vmul.f32 %v1478_v17, %v1478_v17 }
  0xa3   : > { %v317_v40 = vmul.f32 %v1521_v37, %v1521_v37 }
  0xa9   : > { %v1480_v18 = vpop.f32.mrf.mxu1  ;;  %v1536_v43 = vpop.f32.mrf.mxu0 }
  0xaa   : > { %v313_v44 = vmul.f32 %v1536_v43, %v1536_v43  ;;  %v316_v47 = vmul.f32 %v1480_v18, %v1480_v18  ;;  %v1558_v50 = vpop.f32.mrf.mxu2 }
  0xab   : > { %v318_v51 = vmul.f32 %v1558_v50, %v1558_v50 }
  0xb1   : > { %v1482_v19 = vpop.f32.mrf.mxu1 }
  0xb2   : > { %v431_v41 = vmul.f32 %v1482_v19, %v1482_v19 }
  0xb9   : > { %v1484_v20 = vpop.f32.mrf.mxu1 }
  0xba   : > { %v432_v46 = vmul.f32 %v1484_v20, %v1484_v20 }
  0xc1   : > { %v1486_v21 = vpop.f32.mrf.mxu1 }
  0xc2   : > { %v433_v25 = vmul.f32 %v1486_v21, %v1486_v21 }
  0xc9   : > { %v1488_v22 = vpop.f32.mrf.mxu1 }
  0xca   : > { %v434_v23 = vmul.f32 %v1488_v22, %v1488_v22 }
  0xcc   : > { %445 = vadd.xlane.f32.xlu2 %v434_v23 }
  0xd1   : > { %v1492_v24 = vpop.f32.mrf.mxu1 }
  0xd2   : > { %v435_v32 = vmul.f32 %v1492_v24, %v1492_v24 }
  0xd4   : > { %443 = vadd.xlane.f32.xlu2 %v433_v25 }
  0xd9   : > { %v1500_v28 = vpop.f32.mrf.mxu1 }
  0xda   : > { %v436_v29 = vmul.f32 %v1500_v28, %v1500_v28 }
  0xdc   : > { %449 = vadd.xlane.f32.xlu1 %v436_v29  ;;  %319 = vadd.xlane.f32.xlu2 %v311_v27 }
  0xe1   : > { %v1507_v31 = vpop.f32.mrf.mxu1 }
  0xe2   : > { %v437_v45 = vmul.f32 %v1507_v31, %v1507_v31 }
  0xe4   : > { %447 = vadd.xlane.f32.xlu1 %v435_v32  ;;  %325 = vadd.xlane.f32.xlu2 %v314_v33 }
  0xe9   : > { %v1526_v39 = vpop.f32.mrf.mxu1 }
  0xea   : > { %v438_v42 = vmul.f32 %v1526_v39, %v1526_v39 }
  0xec   : > { %439 = vadd.xlane.f32.xlu1 %v431_v41  ;;  %453 = vadd.xlane.f32.xlu0 %v438_v42 }
  0xed   : > { %331 = vadd.xlane.f32.xlu2 %v317_v40 }
  0xf4   : > { %451 = vadd.xlane.f32.xlu0 %v437_v45  ;;  %323 = vadd.xlane.f32.xlu1 %v313_v44 }
  0xfc   : > { %441 = vadd.xlane.f32.xlu0 %v432_v46  ;;  %329 = vadd.xlane.f32.xlu1 %v316_v47 }
 0x104   : > { %321 = vadd.xlane.f32.xlu0 %v312_v48  ;;  %v1609_v48 = vpop.f32.mrf.mxu2 }
 0x10c   : > { %327 = vadd.xlane.f32.xlu0 %v315_v49 }
 0x114   : > { %333 = vadd.xlane.f32.xlu0 %v318_v51 }
 0x13f   : > { %v446_v53 = vpop.xlane.xlu2 %445 }
 0x140   : > { %v1573_v59 = vadd.f32 1e-12, %v446_v53 }
 0x142   : > { %vm499_vm14 = vweird.f32 %v1573_v59 }
 0x147   : > { %v444_v60 = vpop.xlane.xlu2 %443 }
 0x148   : > { %v1579_v62 = vadd.f32 1e-12, %v444_v60 }
 0x14f   : > { %v450_v52 = vpop.xlane.xlu1 %449  ;;  %v320_v15 = vpop.xlane.xlu2 %319 }
 0x150   : > { %v1568_v54 = vadd.f32 1e-12, %v450_v52  ;;  %v1601_v33 = vadd.f32 1e-12, %v320_v15 }
 0x152   : > { %1167 = vrsqrt.f32 %v1568_v54  ;;  %vm519_vm8 = vweird.f32 %v1568_v54 }
 0x157   : > { %v448_v55 = vpop.xlane.xlu1 %447 }
 0x158   : > { %v1571_v57 = vadd.f32 1e-12, %v448_v55  ;;  %v1576_v61 = vpop.eup %1167 }
 0x159   : > { %v514_v0 = vmul.f32 %v1576_v61, %v1568_v54  ;;  %vm520_vm5 = vweird.f32 %v1576_v61 }
 0x15a   : > { %vm521_vm9 = vmor %vm519_vm8, %vm520_vm5  ;;  %vm509_vm11 = vweird.f32 %v1571_v57 }
 0x15b   : > { %v515_v6 = vmul.f32 %v1576_v61, %v514_v0 }
 0x15d   : > { %v516_v14 = vmul.f32 0.5, %v515_v6 }
 0x15f   : > { %v454_v56 = vpop.xlane.xlu0 %453  ;;  %v440_v9 = vpop.xlane.xlu1 %439  ;;  %v517_v41 = vsub.f32 1.5, %v516_v14 }
 0x160   : > { %v462_v58 = vadd.f32 1e-12, %v454_v56  ;;  %v1593_v23 = vadd.f32 1e-12, %v440_v9 }
 0x161   : > { %v518_v55 = vmul.f32 %v1576_v61, %v517_v41 }
 0x162   : > { %1169 = vrsqrt.f32 %v462_v58  ;;  %vm539_vm2 = vweird.f32 %v462_v58 }
 0x163   : > { %1171 = vrsqrt.f32 %v1571_v57  ;;  %v522_v9 = vsel %vm521_vm9, %v1576_v61, %v518_v55  ;;  %vm469_vm9 = vweird.f32 %v1593_v23 }
 0x164   : > { %1173 = vrsqrt.f32 %v1573_v59 }
 0x167   : > { %v452_v63 = vpop.xlane.xlu0 %451 }
 0x168   : > { %v461_v1 = vadd.f32 1e-12, %v452_v63  ;;  %v1170_v2 = vpop.eup %1169 }
 0x169   : > { %v1583_v3 = vpop.eup %1171  ;;  %v534_v4 = vmul.f32 %v1170_v2, %v462_v58  ;;  %vm540_vm1 = vweird.f32 %v1170_v2 }
 0x16a   : > { %1175 = vrsqrt.f32 %v461_v1  ;;  %v1586_v5 = vpop.eup %1173  ;;  %v504_v8 = vmul.f32 %v1583_v3, %v1571_v57  ;;  %vm541_vm3 = vmor %vm539_vm2, %vm540_vm1  ;;  %vm529_vm6 = vweird.f32 %v461_v1  ;;  %vm510_vm10 = vweird.f32 %v1583_v3 }
 0x16b   : > { %1177 = vrsqrt.f32 %v1579_v62  ;;  %v535_v7 = vmul.f32 %v1170_v2, %v534_v4  ;;  %v494_v11 = vmul.f32 %v1586_v5, %v1573_v59  ;;  %vm511_vm12 = vmor %vm509_vm11, %vm510_vm10  ;;  %vm500_vm13 = vweird.f32 %v1586_v5 }
 0x16c   : > { %v505_v30 = vmul.f32 %v1583_v3, %v504_v8  ;;  %vm501_vm15 = vmor %vm499_vm14, %vm500_vm13  ;;  %vm489_vm1 = vweird.f32 %v1579_v62 }
 0x16d   : > { %v536_v10 = vmul.f32 0.5, %v535_v7  ;;  %v495_v38 = vmul.f32 %v1586_v5, %v494_v11  ;;  %v324_v11 = vpop.xlane.xlu1 %323 }
 0x16e   : > { %v506_v42 = vmul.f32 0.5, %v505_v30 }
 0x16f   : > { %v442_v12 = vpop.xlane.xlu0 %441  ;;  %v537_v27 = vsub.f32 1.5, %v536_v10  ;;  %v496_v51 = vmul.f32 0.5, %v495_v38 }
 0x170   : > { %v1176_v13 = vpop.eup %1175  ;;  %v1595_v25 = vadd.f32 1e-12, %v442_v12  ;;  %v507_v56 = vsub.f32 1.5, %v506_v42  ;;  %v548_v12 = vmul.f32 %v522_v9, %v1500_v28 }
 0x171   : > { %v1597_v29 = vpop.eup %1177  ;;  %v524_v32 = vmul.f32 %v1176_v13, %v461_v1  ;;  %v538_v36 = vmul.f32 %v1170_v2, %v537_v27  ;;  %vm530_vm4 = vweird.f32 %v1176_v13  ;;  %v1644_v27 = vadd.f32 1e-12, %v324_v11 }
 0x172   : > { %1179 = vrsqrt.f32 %v1595_v25  ;;  %v484_v40 = vmul.f32 %v1597_v29, %v1579_v62  ;;  %vm531_vm7 = vmor %vm529_vm6, %vm530_vm4  ;;  %v508_v54 = vmul.f32 %v1583_v3, %v507_v56  ;;  %vm490_vm0 = vweird.f32 %v1597_v29 }
 0x173   : > { %v525_v35 = vmul.f32 %v1176_v13, %v524_v32  ;;  %1181 = vrsqrt.f32 %v1593_v23  ;;  %v542_v45 = vsel %vm541_vm3, %v1170_v2, %v538_v36  ;;  %v497_v2 = vsub.f32 1.5, %v496_v51  ;;  %vm491_vm2 = vmor %vm489_vm1, %vm490_vm0 }
 0x174   : > { %v550_v46 = vmul.f32 %v542_v45, %v1526_v39  ;;  %1183 = vrsqrt.f32 %v1601_v33  ;;  %v485_v52 = vmul.f32 %v1597_v29, %v484_v40  ;;  %v512_v57 = vsel %vm511_vm12, %v1583_v3, %v508_v54 }
 0x175   : > { %v526_v44 = vmul.f32 0.5, %v525_v35  ;;  %v547_v28 = vmul.f32 %v512_v57, %v1492_v24  ;;  %v326_v24 = vpop.xlane.xlu2 %325  ;;  %vm479_vm4 = vweird.f32 %v1595_v25 }
 0x176   : > { %659 = vmatpush.xpose.msra.mxu3 %v550_v46  ;;  %v486_v4 = vmul.f32 0.5, %v485_v52  ;;  %v1663_v62 = vadd.f32 1e-12, %v326_v24 }
 0x177   : > { %v527_v47 = vsub.f32 1.5, %v526_v44  ;;  %v322_v53 = vpop.xlane.xlu0 %321 }
 0x178   : > { %v1611_v49 = vpop.eup %1179  ;;  %v1621_v63 = vadd.f32 1e-12, %v322_v53  ;;  %v487_v61 = vsub.f32 1.5, %v486_v4 }
 0x179   : > { %v474_v39 = vmul.f32 %v1611_v49, %v1595_v25  ;;  %v528_v58 = vmul.f32 %v1176_v13, %v527_v47  ;;  %v1618_v60 = vpop.eup %1181  ;;  %vm480_vm3 = vweird.f32 %v1611_v49 }
 0x17a   : > { %v1625_v1 = vpop.eup %1183  ;;  %v464_v7 = vmul.f32 %v1618_v60, %v1593_v23  ;;  %1185 = vrsqrt.f32 %v1621_v63  ;;  %v488_v3 = vmul.f32 %v1597_v29, %v487_v61  ;;  %vm481_vm5 = vmor %vm479_vm4, %vm480_vm3  ;;  %vm470_vm6 = vweird.f32 %v1618_v60 }
 0x17b   : > { %v532_v0 = vsel %vm531_vm7, %v1176_v13, %v528_v58  ;;  %v475_v8 = vmul.f32 %v1611_v49, %v474_v39  ;;  %v344_v10 = vmul.f32 %v1625_v1, %v1601_v33  ;;  %v498_v13 = vmul.f32 %v1586_v5, %v497_v2  ;;  %vm471_vm10 = vmor %vm469_vm9, %vm470_vm6 }
 0x17c   : > { %v549_v6 = vmul.f32 %v532_v0, %v1507_v31  ;;  %v1634_v31 = vpop.f32.mrf.mxu2  ;;  %v465_v14 = vmul.f32 %v1618_v60, %v464_v7  ;;  %1187 = vrsqrt.f32 %v1644_v27  ;;  %vm349_vm7 = vweird.f32 %v1601_v33 }
 0x17d   : > { %v476_v15 = vmul.f32 0.5, %v475_v8  ;;  %v345_v30 = vmul.f32 %v1625_v1, %v344_v10  ;;  %v502_v38 = vsel %vm501_vm15, %v1586_v5, %v498_v13  ;;  %v492_v5 = vsel %vm491_vm2, %v1597_v29, %v488_v3 }
 0x17e   : > { %660 = vmatpush.xpose.msra.mxu3 %v549_v6  ;;  %v466_v35 = vmul.f32 0.5, %v465_v14  ;;  %v546_v42 = vmul.f32 %v502_v38, %v1488_v22  ;;  %v545_v51 = vmul.f32 %v492_v5, %v1486_v21  ;;  %vm350_vm8 = vweird.f32 %v1625_v1 }
 0x17f   : > { %v477_v36 = vsub.f32 1.5, %v476_v15  ;;  %v346_v40 = vmul.f32 0.5, %v345_v30  ;;  %1189 = vrsqrt.f32 %v1663_v62  ;;  %v328_v55 = vpop.xlane.xlu0 %327  ;;  %vm351_vm11 = vmor %vm349_vm7, %vm350_vm8  ;;  %vm359_vm12 = vweird.f32 %v1621_v63 }
 0x180   : > { %v1649_v32 = vpop.eup %1185  ;;  %v467_v44 = vsub.f32 1.5, %v466_v35  ;;  %v1681_v39 = vadd.f32 1e-12, %v328_v55  ;;  %vm369_vm15 = vweird.f32 %v1644_v27  ;;  %vm379_vm3 = vweird.f32 %v1663_v62 }
 0x181   : > { %v354_v41 = vmul.f32 %v1649_v32, %v1621_v63  ;;  %v478_v45 = vmul.f32 %v1611_v49, %v477_v36  ;;  %v347_v46 = vsub.f32 1.5, %v346_v40  ;;  %vm360_vm13 = vweird.f32 %v1649_v32 }
 0x182   : > { %661 = vmatpush.xpose.msra.mxu3 %v548_v12  ;;  %v1188_v22 = vpop.eup %1187  ;;  %v468_v29 = vmul.f32 %v1618_v60, %v467_v44  ;;  %1191 = vrsqrt.f32 %v1681_v39  ;;  %vm361_vm14 = vmor %vm359_vm12, %vm360_vm13  ;;  %vm389_vm7 = vweird.f32 %v1681_v39 }
 0x183   : > { %v355_v47 = vmul.f32 %v1649_v32, %v354_v41  ;;  %v482_v52 = vsel %vm481_vm5, %v1611_v49, %v478_v45  ;;  %v364_v21 = vmul.f32 %v1188_v22, %v1644_v27  ;;  %v348_v56 = vmul.f32 %v1625_v1, %v347_v46 }
 0x184   : > { %v1655_v59 = vpop.f32.mrf.mxu2  ;;  %v544_v49 = vmul.f32 %v482_v52, %v1484_v20  ;;  %v472_v33 = vsel %vm471_vm10, %v1618_v60, %v468_v29  ;;  %v330_v20 = vpop.xlane.xlu1 %329  ;;  %vm370_vm0 = vweird.f32 %v1188_v22 }
 0x185   : > { %v356_v53 = vmul.f32 0.5, %v355_v47  ;;  %v365_v58 = vmul.f32 %v1188_v22, %v364_v21  ;;  %v543_v23 = vmul.f32 %v472_v33, %v1482_v19  ;;  %v352_v2 = vsel %vm351_vm11, %v1625_v1, %v348_v56  ;;  %v1190_v4 = vpop.eup %1189  ;;  %vm371_vm1 = vmor %vm369_vm15, %vm370_vm0 }
 0x186   : > { %662 = vmatpush.xpose.msra.mxu3 %v547_v28  ;;  %v423_v60 = vmul.f32 %v352_v2, %v1496_v26  ;;  %v374_v7 = vmul.f32 %v1190_v4, %v1663_v62  ;;  %v1693_v1 = vadd.f32 1e-12, %v330_v20  ;;  %v332_v26 = vpop.xlane.xlu2 %331  ;;  %vm380_vm2 = vweird.f32 %v1190_v4 }
 0x187   : > { %v357_v0 = vsub.f32 1.5, %v356_v53  ;;  %v366_v8 = vmul.f32 0.5, %v365_v58  ;;  %v1700_v15 = vadd.f32 1e-12, %v332_v26  ;;  %v334_v3 = vpop.xlane.xlu0 %333  ;;  %vm381_vm4 = vmor %vm379_vm3, %vm380_vm2  ;;  %vm716_vm2 = vcmask 523264  }
 0x188   : > { %v375_v63 = vmul.f32 %v1190_v4, %v374_v7  ;;  %v1192_v10 = vpop.eup %1191  ;;  %1193 = vrsqrt.f32 %v1693_v1  ;;  %vm399_vm10 = vweird.f32 %v1693_v1 }
 0x189   : > { %v358_v19 = vmul.f32 %v1649_v32, %v357_v0  ;;  %v367_v9 = vsub.f32 1.5, %v366_v8  ;;  %v384_v61 = vmul.f32 %v1192_v10, %v1681_v39  ;;  %1195 = vrsqrt.f32 %v1700_v15 }
 0x18a   : > { %663 = vmatpush.xpose.msra.mxu3 %v546_v42  ;;  %v376_v13 = vmul.f32 0.5, %v375_v63  ;;  %v342_v42 = vadd.f32 1e-12, %v334_v3  ;;  %vm390_vm6 = vweird.f32 %v1192_v10  ;;  %vm409_vm12 = vweird.f32 %v1700_v15 }
 0x18b   : > { %v362_v54 = vsel %vm361_vm14, %v1649_v32, %v358_v19  ;;  %v368_v14 = vmul.f32 %v1188_v22, %v367_v9  ;;  %v385_v28 = vmul.f32 %v1192_v10, %v384_v61  ;;  %v612_v32 = vlaneseq  ;;  %vm391_vm8 = vmor %vm389_vm7, %vm390_vm6 }
 0x18c   : > { %v1675_v25 = vpop.f32.mrf.mxu2  ;;  %v424_v11 = vmul.f32 %v362_v54, %v1513_v34  ;;  %v377_v30 = vsub.f32 1.5, %v376_v13  ;;  %1197 = vrsqrt.f32 %v342_v42  ;;  %vm419_vm15 = vweird.f32 %v342_v42 }
 0x18d   : > { %v372_v27 = vsel %vm371_vm1, %v1188_v22, %v368_v14  ;;  %v386_v38 = vmul.f32 0.5, %v385_v28  ;;  %v613_v24 = vand.u32 127, %v612_v32 }
 0x18e   : > { %664 = vmatpush.xpose.msra.mxu3 %v545_v51  ;;  %v1702_v57 = vpop.eup %1193  ;;  %v425_v35 = vmul.f32 %v372_v27, %v1536_v43  ;;  %v378_v40 = vmul.f32 %v1190_v4, %v377_v30 }
 0x18f   : > { %v394_v34 = vmul.f32 %v1702_v57, %v1693_v1  ;;  %v1196_v44 = vpop.eup %1195  ;;  %v387_v5 = vsub.f32 1.5, %v386_v38  ;;  %vm614_vm5 = vcmp.eq.s32.totalorder %v613_v24, 32  ;;  %vm400_vm9 = vweird.f32 %v1702_v57 }
 0x190   : > { %v382_v45 = vsel %vm381_vm4, %v1190_v4, %v378_v40  ;;  %v404_v46 = vmul.f32 %v1196_v44, %v1700_v15  ;;  %v620_v56 = vsel %vm614_vm5, 1.0, %v1675_v25  ;;  %v618_v2 = vsel %vm614_vm5, 1.0, %v1634_v31  ;;  %vm401_vm11 = vmor %vm399_vm10, %vm400_vm9 }
 0x191   : > { %v395_v41 = vmul.f32 %v1702_v57, %v394_v34  ;;  %v426_v47 = vmul.f32 %v382_v45, %v1476_v16  ;;  %v388_v22 = vmul.f32 %v1192_v10, %v387_v5  ;;  %v617_v20 = vsel %vm614_vm5, 1.0, %v1609_v48 }
 0x192   : > { %665 = vmatpush.xpose.msra.mxu3 %v544_v49  ;;  %v405_v21 = vmul.f32 %v1196_v44, %v404_v46  ;;  %v1198_v49 = vpop.eup %1197  ;;  %vm410_vm13 = vweird.f32 %v1196_v44  ;;  %v1311_v40 = vmov 32  }
 0x193   : > { %v396_v43 = vmul.f32 0.5, %v395_v41  ;;  %v392_v55 = vsel %vm391_vm8, %v1192_v10, %v388_v22  ;;  %v414_v39 = vmul.f32 %v1198_v49, %v342_v42  ;;  %vm411_vm14 = vmor %vm409_vm12, %vm410_vm13  ;;  %vm420_vm0 = vweird.f32 %v1198_v49  ;;  %1164 = vset.pattern.permute.xlu1 %v1311_v40  ;;  %1165 = vset.pattern.permute.xlu2 %v1311_v40 }
 0x194   : > { %v1689_v6 = vpop.f32.mrf.mxu2  ;;  %v406_v33 = vmul.f32 0.5, %v405_v21  ;;  %v427_v58 = vmul.f32 %v392_v55, %v1478_v17  ;;  %vm421_vm1 = vmor %vm419_vm15, %vm420_vm0  ;;  %1166 = vset.pattern.permute.xlu0 %v1311_v40 }
 0x195   : > { %v397_v53 = vsub.f32 1.5, %v396_v43  ;;  %v621_v16 = vsel %vm614_vm5, 1.0, %v1689_v6  ;;  %v415_v17 = vmul.f32 %v1198_v49, %v414_v39 }
 0x196   : > { %666 = vmatpush.xpose.msra.mxu3 %v543_v23  ;;  %v619_v23 = vsel %vm614_vm5, 1.0, %v1655_v59  ;;  %v407_v25 = vsub.f32 1.5, %v406_v33 }
 0x197   : > { %v398_v0 = vmul.f32 %v1702_v57, %v397_v53 }
 0x198   : > { %v408_v6 = vmul.f32 %v1196_v44, %v407_v25 }
 0x199   : > { %667 = vmatmul.f32.vlgmr.msra.gmra.mxu3 %v423_v60  ;;  %v402_v4 = vsel %vm401_vm11, %v1702_v57, %v398_v0  ;;  %v416_v60 = vmul.f32 0.5, %v415_v17 }
 0x19a   : > { %v428_v59 = vmul.f32 %v402_v4, %v1480_v18  ;;  %v412_v7 = vsel %vm411_vm14, %v1196_v44, %v408_v6 }
 0x19b   : > { %v417_v31 = vsub.f32 1.5, %v416_v60  ;;  %v429_v8 = vmul.f32 %v412_v7, %v1521_v37 }
 0x19c   : > { %v603_v12 = vpop.f32.mrf.mxu2 }
 0x19d   : > { %v622_v29 = vsel %vm614_vm5, 1.0, %v603_v12  ;;  %v418_v19 = vmul.f32 %v1198_v49, %v417_v31 }
 0x19f   : > { %v422_v48 = vsel %vm421_vm1, %v1198_v49, %v418_v19 }
 0x1a0   : > { %v430_v1 = vmul.f32 %v422_v48, %v1558_v50 }
 0x1a1   : > { %670 = vmatmul.f32.gmra.mxu3 %v424_v11 }
 0x1a4   : > { %v606_v36 = vpop.f32.mrf.mxu2 }
 0x1a5   : > { %v623_v62 = vsel %vm614_vm5, 1.0, %v606_v36 }
 0x1a9   : > { %673 = vmatmul.f32.gmra.mxu3 %v425_v35 }
 0x1ac   : > { %v609_v51 = vpop.f32.mrf.mxu2 }
 0x1ad   : > { %v624_v52 = vsel %vm614_vm5, 1.0, %v609_v51 }
 0x1ae   : > { %749 = vmatpush.msrb.mxu0 %v624_v52 }
 0x1b0   : > { %750 = vmatpush.msrb.mxu0 %v623_v62 }
 0x1b1   : > { %676 = vmatmul.f32.gmra.mxu3 %v426_v47 }
 0x1b2   : > { %751 = vmatpush.msrb.mxu0 %v622_v29 }
 0x1b4   : > { %752 = vmatpush.msrb.mxu0 %v621_v16 }
 0x1b6   : > { %753 = vmatpush.msrb.mxu0 %v620_v56 }
 0x1b8   : > { %754 = vmatpush.msrb.mxu0 %v619_v23 }
 0x1b9   : > { %679 = vmatmul.f32.gmra.mxu3 %v427_v58 }
 0x1ba   : > { %755 = vmatpush.msrb.mxu0 %v618_v2 }
 0x1bc   : > { %756 = vmatpush.msrb.mxu0 %v617_v20 }
 0x1c1   : > { %682 = vmatmul.f32.gmra.mxu3 %v428_v59 }
 0x1c9   : > { %685 = vmatmul.f32.gmra.mxu3 %v429_v8 }
 0x1d1   : > { %688 = vmatmul.f32.gmra.mxu3 %v430_v1 }
 0x21c   : > { %v668_v63 = vpop.f32.mrf.mxu3 }
 0x21d   : > { %v692_v18 = vmul.f32 1.442695, %v668_v63 }
 0x21f   : > { %1199 = vpow2.f32 %v692_v18 }
 0x224   : > { %v671_v9 = vpop.f32.mrf.mxu3 }
 0x225   : > { %v1200_v54 = vpop.eup %1199  ;;  %v694_v10 = vmul.f32 1.442695, %v671_v9 }
 0x226   : > { %1083 = vmatmul.msk.f32.vlgmr.msrb.gmra.mxu0 %vm716_vm2, %v1200_v54 }
 0x227   : > { %1201 = vpow2.f32 %v694_v10 }
 0x22c   : > { %v674_v26 = vpop.f32.mrf.mxu3 }
 0x22d   : > { %v1202_v11 = vpop.eup %1201  ;;  %v696_v37 = vmul.f32 1.442695, %v674_v26 }
 0x22e   : > { %1084 = vmatmul.msk.f32.gmra.mxu0 %vm716_vm2, %v1202_v11 }
 0x22f   : > { %1203 = vpow2.f32 %v696_v37 }
 0x234   : > { %v677_v12 = vpop.f32.mrf.mxu3 }
 0x235   : > { %v1204_v13 = vpop.eup %1203  ;;  %v698_v50 = vmul.f32 1.442695, %v677_v12 }
 0x236   : > { %1085 = vmatmul.msk.f32.gmra.mxu0 %vm716_vm2, %v1204_v13 }
 0x237   : > { %1205 = vpow2.f32 %v698_v50 }
 0x23c   : > { %v680_v61 = vpop.f32.mrf.mxu3 }
 0x23d   : > { %v1206_v14 = vpop.eup %1205  ;;  %v700_v15 = vmul.f32 1.442695, %v680_v61 }
 0x23e   : > { %1086 = vmatmul.msk.f32.gmra.mxu0 %vm716_vm2, %v1206_v14 }
 0x23f   : > { %1207 = vpow2.f32 %v700_v15 }
 0x244   : > { %v683_v57 = vpop.f32.mrf.mxu3 }
 0x245   : > { %v1208_v30 = vpop.eup %1207  ;;  %v702_v28 = vmul.f32 1.442695, %v683_v57 }
 0x246   : > { %1087 = vmatmul.msk.f32.gmra.mxu0 %vm716_vm2, %v1208_v30 }
 0x247   : > { %1209 = vpow2.f32 %v702_v28 }
 0x24c   : > { %v686_v27 = vpop.f32.mrf.mxu3 }
 0x24d   : > { %v1210_v32 = vpop.eup %1209  ;;  %v704_v34 = vmul.f32 1.442695, %v686_v27 }
 0x24e   : > { %1088 = vmatmul.msk.f32.gmra.mxu0 %vm716_vm2, %v1210_v32 }
 0x24f   : > { %1211 = vpow2.f32 %v704_v34 }
 0x254   : > { %v689_v35 = vpop.f32.mrf.mxu3 }
 0x255   : > { %v1212_v36 = vpop.eup %1211  ;;  %v706_v38 = vmul.f32 1.442695, %v689_v35 }
 0x256   : > { %1089 = vmatmul.msk.f32.gmra.mxu0 %vm716_vm2, %v1212_v36 }
 0x257   : > { %1213 = vpow2.f32 %v706_v38 }
 0x25d   : > { %v1214_v3 = vpop.eup %1213 }
 0x25e   : > { %1090 = vmatmul.msk.f32.gmra.mxu0 %vm716_vm2, %v1214_v3 }
 0x2a3   : > { %v1743_v24 = vpop.f32.mrf.mxu0 }
 0x2a4   : > { %1215 = vrcp.f32 %v1743_v24  ;;  %v793_v45 = vand.u32 2147483648, %v1743_v24  ;;  %v791_v43 = vand.u32 2147483647, %v1743_v24  ;;  %vm787_vm4 = vweird.f32 %v1743_v24 }
 0x2a6   : > { %v794_v22 = vor.u32 1.1754944e-38, %v793_v45  ;;  %vm792_vm6 = vcmp.eq.f32.partialorder %v791_v43, 8.507059e+37 }
 0x2aa   : > { %v1216_v41 = vpop.eup %1215 }
 0x2ab   : > { %v783_v42 = vmul.f32 %v1216_v41, %v1743_v24  ;;  %v1747_v44 = vpop.f32.mrf.mxu0  ;;  %vm788_vm3 = vweird.f32 %v1216_v41 }
 0x2ac   : > { %1217 = vrcp.f32 %v1747_v44  ;;  %vm789_vm5 = vmor %vm787_vm4, %vm788_vm3  ;;  %v807_v55 = vand.u32 2147483648, %v1747_v44  ;;  %v805_v49 = vand.u32 2147483647, %v1747_v44  ;;  %vm801_vm8 = vweird.f32 %v1747_v44 }
 0x2ad   : > { %v784_v5 = vsub.f32 1.0, %v783_v42 }
 0x2ae   : > { %v808_v58 = vor.u32 1.1754944e-38, %v807_v55  ;;  %vm806_vm10 = vcmp.eq.f32.partialorder %v805_v49, 8.507059e+37 }
 0x2af   : > { %v785_v46 = vmul.f32 %v1216_v41, %v784_v5 }
 0x2b1   : > { %v786_v47 = vadd.f32 %v1216_v41, %v785_v46 }
 0x2b2   : > { %v1218_v51 = vpop.eup %1217 }
 0x2b3   : > { %v797_v52 = vmul.f32 %v1218_v51, %v1747_v44  ;;  %v1754_v62 = vpop.f32.mrf.mxu0  ;;  %v790_v29 = vsel %vm789_vm5, %v1216_v41, %v786_v47  ;;  %vm802_vm7 = vweird.f32 %v1218_v51 }
 0x2b4   : > { %1219 = vrcp.f32 %v1754_v62  ;;  %v795_v21 = vsel %vm792_vm6, %v794_v22, %v790_v29  ;;  %vm803_vm9 = vmor %vm801_vm8, %vm802_vm7  ;;  %v821_v17 = vand.u32 2147483648, %v1754_v62  ;;  %v819_v20 = vand.u32 2147483647, %v1754_v62 }
 0x2b5   : > { %v798_v53 = vsub.f32 1.0, %v797_v52  ;;  %896 = vperm.xlu1 %1164, %v795_v21   ;;  %vm815_vm12 = vweird.f32 %v1754_v62 }
 0x2b6   : > { %v822_v6 = vor.u32 1.1754944e-38, %v821_v17  ;;  %vm820_vm14 = vcmp.eq.f32.partialorder %v819_v20, 8.507059e+37 }
 0x2b7   : > { %v799_v16 = vmul.f32 %v1218_v51, %v798_v53 }
 0x2b9   : > { %v800_v56 = vadd.f32 %v1218_v51, %v799_v16 }
 0x2ba   : > { %v1220_v33 = vpop.eup %1219 }
 0x2bb   : > { %v811_v39 = vmul.f32 %v1220_v33, %v1754_v62  ;;  %v1761_v0 = vpop.f32.mrf.mxu0  ;;  %v804_v23 = vsel %vm803_vm9, %v1218_v51, %v800_v56  ;;  %vm816_vm11 = vweird.f32 %v1220_v33 }
 0x2bc   : > { %1221 = vrcp.f32 %v1761_v0  ;;  %v809_v2 = vsel %vm806_vm10, %v808_v58, %v804_v23  ;;  %vm817_vm13 = vmor %vm815_vm12, %vm816_vm11  ;;  %v835_v1 = vand.u32 2147483648, %v1761_v0  ;;  %v833_v18 = vand.u32 2147483647, %v1761_v0 }
 0x2bd   : > { %v812_v25 = vsub.f32 1.0, %v811_v39  ;;  %901 = vperm.xlu2 %1165, %v809_v2   ;;  %vm829_vm0 = vweird.f32 %v1761_v0 }
 0x2be   : > { %v836_v10 = vor.u32 1.1754944e-38, %v835_v1  ;;  %vm834_vm2 = vcmp.eq.f32.partialorder %v833_v18, 8.507059e+37 }
 0x2bf   : > { %v813_v4 = vmul.f32 %v1220_v33, %v812_v25 }
 0x2c1   : > { %v814_v59 = vadd.f32 %v1220_v33, %v813_v4 }
 0x2c2   : > { %v1222_v60 = vpop.eup %1221 }
 0x2c3   : > { %v825_v31 = vmul.f32 %v1222_v60, %v1761_v0  ;;  %v1768_v7 = vpop.f32.mrf.mxu0  ;;  %v818_v8 = vsel %vm817_vm13, %v1220_v33, %v814_v59  ;;  %vm830_vm15 = vweird.f32 %v1222_v60 }
 0x2c4   : > { %1223 = vrcp.f32 %v1768_v7  ;;  %v823_v19 = vsel %vm820_vm14, %v822_v6, %v818_v8  ;;  %vm831_vm1 = vmor %vm829_vm0, %vm830_vm15  ;;  %v849_v50 = vand.u32 2147483648, %v1768_v7  ;;  %v847_v14 = vand.u32 2147483647, %v1768_v7 }
 0x2c5   : > { %v826_v48 = vsub.f32 1.0, %v825_v31  ;;  %906 = vperm.xlu0 %1166, %v823_v19   ;;  %vm843_vm4 = vweird.f32 %v1768_v7 }
 0x2c6   : > { %v850_v30 = vor.u32 1.1754944e-38, %v849_v50  ;;  %vm848_vm6 = vcmp.eq.f32.partialorder %v847_v14, 8.507059e+37 }
 0x2c7   : > { %v827_v63 = vmul.f32 %v1222_v60, %v826_v48 }
 0x2c9   : > { %v828_v9 = vadd.f32 %v1222_v60, %v827_v63 }
 0x2ca   : > { %v1224_v54 = vpop.eup %1223 }
 0x2cb   : > { %v839_v26 = vmul.f32 %v1224_v54, %v1768_v7  ;;  %v1775_v11 = vpop.f32.mrf.mxu0  ;;  %v832_v37 = vsel %vm831_vm1, %v1222_v60, %v828_v9  ;;  %vm844_vm3 = vweird.f32 %v1224_v54 }
 0x2cc   : > { %1225 = vrcp.f32 %v1775_v11  ;;  %v837_v12 = vsel %vm834_vm2, %v836_v10, %v832_v37  ;;  %vm845_vm5 = vmor %vm843_vm4, %vm844_vm3  ;;  %v863_v36 = vand.u32 2147483648, %v1775_v11  ;;  %v861_v3 = vand.u32 2147483647, %v1775_v11 }
 0x2cd   : > { %v840_v13 = vsub.f32 1.0, %v839_v26  ;;  %911 = vperm.xlu2 %1165, %v837_v12   ;;  %vm857_vm8 = vweird.f32 %v1775_v11 }
 0x2ce   : > { %v864_v42 = vor.u32 1.1754944e-38, %v863_v36  ;;  %vm862_vm10 = vcmp.eq.f32.partialorder %v861_v3, 8.507059e+37 }
 0x2cf   : > { %v841_v61 = vmul.f32 %v1224_v54, %v840_v13 }
 0x2d1   : > { %v842_v15 = vadd.f32 %v1224_v54, %v841_v61 }
 0x2d2   : > { %v1226_v57 = vpop.eup %1225 }
 0x2d3   : > { %v853_v28 = vmul.f32 %v1226_v57, %v1775_v11  ;;  %v1782_v27 = vpop.f32.mrf.mxu0  ;;  %v846_v32 = vsel %vm845_vm5, %v1224_v54, %v842_v15  ;;  %vm858_vm7 = vweird.f32 %v1226_v57 }
 0x2d4   : > { %1227 = vrcp.f32 %v1782_v27  ;;  %v851_v34 = vsel %vm848_vm6, %v850_v30, %v846_v32  ;;  %vm859_vm9 = vmor %vm857_vm8, %vm858_vm7  ;;  %v877_v51 = vand.u32 2147483648, %v1782_v27  ;;  %v875_v52 = vand.u32 2147483647, %v1782_v27 }
 0x2d5   : > { %v854_v35 = vsub.f32 1.0, %v853_v28  ;;  %916 = vperm.xlu1 %1164, %v851_v34   ;;  %vm871_vm12 = vweird.f32 %v1782_v27 }
 0x2d6   : > { %v878_v53 = vor.u32 1.1754944e-38, %v877_v51  ;;  %vm876_vm14 = vcmp.eq.f32.partialorder %v875_v52, 8.507059e+37 }
 0x2d7   : > { %v855_v38 = vmul.f32 %v1226_v57, %v854_v35 }
 0x2d9   : > { %v856_v40 = vadd.f32 %v1226_v57, %v855_v38 }
 0x2da   : > { %v1228_v41 = vpop.eup %1227 }
 0x2db   : > { %v867_v5 = vmul.f32 %v1228_v41, %v1782_v27  ;;  %v779_v45 = vpop.f32.mrf.mxu0  ;;  %v860_v46 = vsel %vm859_vm9, %v1226_v57, %v856_v40  ;;  %vm872_vm11 = vweird.f32 %v1228_v41 }
 0x2dc   : > { %1229 = vrcp.f32 %v779_v45  ;;  %v865_v43 = vsel %vm862_vm10, %v864_v42, %v860_v46  ;;  %vm873_vm13 = vmor %vm871_vm12, %vm872_vm11  ;;  %v891_v33 = vand.u32 2147483648, %v779_v45  ;;  %v889_v39 = vand.u32 2147483647, %v779_v45 }
 0x2dd   : > { %v868_v47 = vsub.f32 1.0, %v867_v5  ;;  %921 = vperm.xlu2 %1165, %v865_v43   ;;  %vm885_vm0 = vweird.f32 %v779_v45 }
 0x2de   : > { %v892_v2 = vor.u32 1.1754944e-38, %v891_v33  ;;  %vm890_vm2 = vcmp.eq.f32.partialorder %v889_v39, 8.507059e+37 }
 0x2df   : > { %v869_v22 = vmul.f32 %v1228_v41, %v868_v47 }
 0x2e1   : > { %v870_v29 = vadd.f32 %v1228_v41, %v869_v22 }
 0x2e2   : > { %v1230_v21 = vpop.eup %1229 }
 0x2e3   : > { %v881_v55 = vmul.f32 %v1230_v21, %v779_v45  ;;  %v874_v16 = vsel %vm873_vm13, %v1228_v41, %v870_v29  ;;  %vm886_vm15 = vweird.f32 %v1230_v21 }
 0x2e4   : > { %v879_v49 = vsel %vm876_vm14, %v878_v53, %v874_v16  ;;  %vm887_vm1 = vmor %vm885_vm0, %vm886_vm15 }
 0x2e5   : > { %v882_v56 = vsub.f32 1.0, %v881_v55  ;;  %926 = vperm.xlu1 %1164, %v879_v49  }
 0x2e7   : > { %v883_v58 = vmul.f32 %v1230_v21, %v882_v56 }
 0x2e9   : > { %v884_v23 = vadd.f32 %v1230_v21, %v883_v58 }
 0x2eb   : > { %v888_v25 = vsel %vm887_vm1, %v1230_v21, %v884_v23 }
 0x2ec   : > { %v893_v17 = vsel %vm890_vm2, %v892_v2, %v888_v25 }
 0x2ed   : > { %931 = vperm.xlu2 %1165, %v893_v17  }
 0x317   : > { %v902_v4 = vpop.permute.xlu2 %901 }
 0x318   : > { %v935_v20 = vmul.f32 %v902_v4, %v1747_v44 }
 0x31a   : > { %v943_v59 = vmax.f32 %v935_v20, 0.0 }
 0x31c   : > { %951 = vst [vmem:[%s1796_s19 + $0x8] sm:$0xff] %v943_v59 }
 0x327   : > { %v912_v60 = vpop.permute.xlu2 %911  ;;  %v897_v6 = vpop.permute.xlu1 %896 }
 0x328   : > { %v937_v31 = vmul.f32 %v912_v60, %v1761_v0  ;;  %v934_v8 = vmul.f32 %v897_v6, %v1743_v24 }
 0x32a   : > { %v945_v19 = vmax.f32 %v937_v31, 0.0  ;;  %v942_v48 = vmax.f32 %v934_v8, 0.0 }
 0x32c   : > { %953 = vst [vmem:[%s1796_s19 + $0x18] sm:$0xff] %v945_v19 }
 0x32d   : > { %950 = vst [vmem:[%s1796_s19] sm:$0xff] %v942_v48 }
 0x337   : > { %v907_v44 = vpop.permute.xlu0 %906  ;;  %v922_v1 = vpop.permute.xlu2 %921 }
 0x338   : > { %v936_v63 = vmul.f32 %v907_v44, %v1754_v62  ;;  %v939_v18 = vmul.f32 %v922_v1, %v1775_v11 }
 0x33a   : > { %v944_v9 = vmax.f32 %v936_v63, 0.0  ;;  %v947_v54 = vmax.f32 %v939_v18, 0.0 }
 0x33c   : > { %952 = vst [vmem:[%s1796_s19 + $0x10] sm:$0xff] %v944_v9 }
 0x33d   : > { %955 = vst [vmem:[%s1796_s19 + $0x28] sm:$0xff] %v947_v54 }
 0x347   : > { %v932_v0 = vpop.permute.xlu2 %931  ;;  %v917_v24 = vpop.permute.xlu1 %916 }
 0x348   : > { %v941_v10 = vmul.f32 %v932_v0, %v779_v45  ;;  %v938_v26 = vmul.f32 %v917_v24, %v1768_v7 }
 0x34a   : > { %v949_v37 = vmax.f32 %v941_v10, 0.0  ;;  %v946_v12 = vmax.f32 %v938_v26, 0.0 }
 0x34c   : > { %957 = vst [vmem:[%s1796_s19 + $0x38] sm:$0xff] %v949_v37 }
 0x34d   : > { %954 = vst [vmem:[%s1796_s19 + $0x20] sm:$0xff] %v946_v12 }
 0x357   : > { %v927_v62 = vpop.permute.xlu1 %926 }
 0x358   : > { %v940_v11 = vmul.f32 %v927_v62, %v1782_v27 }
 0x35a   : > { %v948_v13 = vmax.f32 %v940_v11, 0.0 }
 0x35c   : > { %956 = vst [vmem:[%s1796_s19 + $0x30] sm:$0xff] %v948_v13 }
 0x35d   : > { %1258 = shalt.err (!%p1255_p5)
}
 0x35e   : > { %s1312_s10 = smov 128   ;;  %s1313_s11 = smov 8  }
 0x35f   : > { %1106 = dma.vmem_to_hbm [thread:$0]  (%p1374_p4), %s974_s28, 1024, %s976_s29, %s959_s30, %s1312_s10, %s1312_s10, %s1313_s11  }
 0x360 PF: > { %p1112_p6 = scmp.ge.s32.totalorder %s1309_s17, 2  ;;  %s990_s18 = sand.u32 1, %s1289_s12  }
 0x361   : > { %s991_s19 = scalar_lea.sflag [#allocation6], %s990_s18 }
 0x362   : > { %p1109_p7 = pnand %p1112_p6, %p1381_p8 }
 0x364   : > { %p1110_p9 = pneg %p1109_p7 }
 0x366   : > { %1284 = dma.done.wait (%p1110_p9), %s991_s19, 1024  }
 0x367   : > { %1286 = vsyncadd (%p1110_p9), %s991_s19, 4294966272  ;;  %s16_s17 = sadd.s32 1, %s1309_s17   ;;  %s1857_s12 = smov %s1293_s13 }
 0x368   : > { %p13_p10 = scmp.ge.s32.totalorder %s16_s17, 4   ;;  %s1858_s13 = smov %s1297_s14 }
 0x369   : > { %s1859_s14 = smov %s1387_s25  ;;  %s1860_s15 = smov %s1305_s16 }
 0x36a   : > { %s1861_s16 = smov %s1863_s20  ;;  %15 = sbr.rel (!%p13_p10) target bundleno = 4 (0x4), region = 72 }
 0x36f   :  { %997 = vsyncpa [#allocation6], 1 }
 0x370   :  { %999 = vsyncpa [#allocation6 + $0x1], 1 }

</bundles_post_ra>
